<compile_context>
chip_gen: v6e
topology: v6e:2x2x1
jax: 0.10.0
libtpu: 0.0.40
codegen_flags: <defaults>
</compile_context>

<pallas_src>
import jax
import jax.numpy as jnp
from jax.experimental import pallas as pl
from jax.experimental.pallas import tpu as pltpu  # noqa: F401  (TPU backend)


def _normalize_kernel(k_ref, o_ref):
    # ReLU (VPU), global sum (XLU) in f32, exact scalar reciprocal,
    # broadcast multiply, cast back to the output dtype.
    k = jnp.maximum(k_ref[...].astype(jnp.float32), 0.0)
    inv = 1.0 / jnp.sum(k)              # exact scalar reciprocal (no approx)
    o_ref[...] = (k * inv).astype(o_ref.dtype)


@jax.jit
def normalize_kernel(k):
    """ReLU + normalize-by-global-sum, matching Normalize_Kernel.forward."""
    orig_shape = k.shape
    orig_dtype = k.dtype
    n = k.size

    # Lane-dense layout: flatten and view as (rows, 128).  Only pad to a
    # multiple of 128 lanes, and only when actually ragged; zeros are exactly
    # neutral for ReLU + sum.
    LANES = 128
    n_pad = ((n + LANES - 1) // LANES) * LANES
    flat = k.reshape(-1)
    if n_pad != n:
        flat = jnp.pad(flat, (0, n_pad - n))
    x2d = flat.reshape(n_pad // LANES, LANES)

    out2d = pl.pallas_call(
        _normalize_kernel,
        out_shape=jax.ShapeDtypeStruct(x2d.shape, orig_dtype),
        grid=(),  # whole (small) tensor in one VMEM block — do not tile
        in_specs=[pl.BlockSpec(x2d.shape, lambda: (0, 0))],
        out_specs=pl.BlockSpec(x2d.shape, lambda: (0, 0)),
        input_output_aliases={0: 0},  # reuse the input HBM buffer
    )(x2d)

    out_flat = out2d.reshape(-1)
    if n_pad != n:
        out_flat = out_flat[:n]
    return out_flat.reshape(orig_shape)


if __name__ == "__main__":
    key = jax.random.PRNGKey(0)
    # Small NCHW-style kernel tensor (batch=2, channels=4, spatial=16x16).
    x = jax.random.normal(key, (2, 4, 16, 16), dtype=jnp.float32)

    out = normalize_kernel(x)
    out = jax.block_until_ready(out)

    # Reference check (plain JAX mirror of the PyTorch forward).
    ref_relu = jnp.maximum(x, 0.0)
    ref = ref_relu / jnp.sum(ref_relu)
    assert out.shape == x.shape and out.dtype == x.dtype
    assert jnp.allclose(out, ref, atol=1e-6, rtol=1e-6)

    print("KERNEL_OK")
</pallas_src>

<mosaic_0001>
module attributes {stable_mosaic.version = 11 : i64} {
  func.func @_normalize_kernel(%arg0: memref<16x128xf32, #tpu.memory_space<vmem>>, %arg1: memref<16x128xf32, #tpu.memory_space<vmem>>) attributes {dimension_semantics = [], scalar_prefetch = 0 : i64, scratch_operands = 0 : i64, tpu.core_type = #tpu.core_type<tc>} {
    %c0 = arith.constant 0 : index
    %c0_0 = arith.constant 0 : index
    %0 = vector.load %arg0[%c0, %c0_0] : memref<16x128xf32, #tpu.memory_space<vmem>>, vector<16x128xf32>
    %cst = arith.constant 0.000000e+00 : f32
    %1 = vector.broadcast %cst : f32 to vector<16x128xf32>
    %2 = arith.maximumf %0, %1 : vector<16x128xf32>
    %3 = vector.shape_cast %2 : vector<16x128xf32> to vector<1x16x128xf32>
    %cst_1 = arith.constant dense<0.000000e+00> : vector<1xf32>
    %4 = vector.multi_reduction <add>, %3, %cst_1 [1, 2] : vector<1x16x128xf32> to vector<1xf32>
    %5 = vector.shape_cast %4 : vector<1xf32> to vector<1x1x1xf32>
    %6 = vector.extract %5[0, 0, 0] : f32 from vector<1x1x1xf32>
    %cst_2 = arith.constant 1.000000e+00 : f32
    %7 = arith.divf %cst_2, %6 : f32
    %8 = vector.broadcast %7 : f32 to vector<16x128xf32>
    %9 = arith.mulf %2, %8 : vector<16x128xf32>
    %c0_3 = arith.constant 0 : index
    %c0_4 = arith.constant 0 : index
    %10 = vector.load %arg1[%c0_3, %c0_4] : memref<16x128xf32, #tpu.memory_space<vmem>>, vector<16x128xf32>
    tpu.vector_store %arg1[%c0_3, %c0_4], %9 {strides = array<i32>} : memref<16x128xf32, #tpu.memory_space<vmem>>, vector<16x128xf32>,
    return
  }
}

</mosaic_0001>

<bundles_post_ra>
// kernel: normalize_kernel.1
= control target key start
LH: loop header
LB: loop body
LE: loop exit
PB: predicated region body
PF: predicated region fallthrough
CT: control target
= control target key end

     0   :  { %s62_s0 = inlined_call_operand.vmem [shape: f32[16,128], index: 0, kind: input, shape index: {}, may-alias: {0,1}]   ;;  %s63_s1 = inlined_call_operand.vmem [shape: f32[16,128], index: 1, kind: output, shape index: {}, may-alias: {0,1}]  }
   0x1   :  { %v8_v0 = vld [vmem:[%s62_s0] sm:$0xff]  ;;  %v9_v1 = vld [vmem:[%s62_s0 + $0x8] sm:$0xff] }
   0x2   :  { %v10_v2 = vmax.f32 %v8_v0, 0.0  ;;  %v11_v3 = vmax.f32 %v9_v1, 0.0 }
   0x4   :  { %v12_v4 = vadd.f32 %v11_v3, %v10_v2 }
   0x6   :  { %13 = vadd.xlane.f32.xlu0 %v12_v4 }
  0x8f   :  { %v14_v5 = vpop.xlane.xlu0 %13 }
  0x90   :  { %v15_v6 = vrot.slane %v14_v5, 4 }
  0x92   :  { %v16_v7 = vadd.f32 %v15_v6, %v14_v5 }
  0x94   :  { %v17_v8 = vrot.slane %v16_v7, 2 }
  0x96   :  { %v18_v9 = vadd.f32 %v17_v8, %v16_v7 }
  0x98   :  { %v19_v10 = vrot.slane %v18_v9, 1 }
  0x9a   :  { %v20_v11 = vadd.f32 %v19_v10, %v18_v9 }
  0x9c   :  { %34 = vpush %v20_v11 }
  0xcd   :  { %s35_s10 = spop %34 }
  0xce   :  { %v22_v12 = vstv %s35_s10 }
  0xcf   :  { %38 = vrcp.f32 %v22_v12 }
  0xdc   :  { %v39_v13 = vpop.eup %38 }
  0xdd   :  { %36 = vpush %v39_v13 }
 0x10e   :  { %s37_s11 = spop %36 }
 0x10f   :  { %v25_v14 = vstv %s37_s11 }
 0x110   :  { %v26_v15 = vmul.f32 %v25_v14, %v10_v2  ;;  %v27_v16 = vmul.f32 %v25_v14, %v11_v3 }
 0x112   :  { %28 = vst [vmem:[%s63_s1] sm:$0xff] %v26_v15  ;;  %29 = vst [vmem:[%s63_s1 + $0x8] sm:$0xff] %v27_v16 }

</bundles_post_ra>
